<compile_context>
chip_gen: v7x
topology: tpu7x:2x2x1
jax: 0.10.0
libtpu: 0.0.40
codegen_flags: <defaults>
</compile_context>

<pallas_src>
import jax
import jax.numpy as jnp
from jax.experimental import pallas as pl
from jax.experimental.pallas import tpu as pltpu


def _round_up(x, m):
    return ((x + m - 1) // m) * m


def _device_kind():
    try:
        return jax.devices()[0].device_kind.lower()
    except Exception:
        return ""


def _default_block_bytes(kind):
    # Generation-aware per-block budget (2 in + 2 out buffers of this size).
    if "v7" in kind:
        return 4 * 1024 * 1024   # cap: 64 MiB per-TC physical / 32 MiB scoped default
    if "v6" in kind:
        return 4 * 1024 * 1024   # 128 MiB physical, plenty of headroom
    return 2 * 1024 * 1024       # v5e (16 MiB scoped default) / unknown


def _frozen_bn_kernel(x_ref, scale_ref, shift_ref, o_ref):
    # x_ref:     (bn, C, ts)  -- C on sublanes, spatial on lanes
    # scale_ref: (C, 1)       -- broadcast along lanes (cheap direction)
    # shift_ref: (C, 1)
    scale = scale_ref[...][None, :, :]            # (1, C, 1)
    shift = shift_ref[...][None, :, :]            # (1, C, 1)
    x = x_ref[...].astype(scale.dtype)            # f32 math, or native bf16 on v6e/v7x
    o_ref[...] = (x * scale + shift).astype(o_ref.dtype)


def frozen_batch_norm_2d(
    x,
    weight,
    bias,
    running_mean,
    running_var,
    *,
    eps=1e-5,
    target_block_bytes=None,
):
    """x: (N, C, H, W); params: (C,). Returns (N, C, H, W), same dtype as x."""
    N, C, H, W = x.shape
    S = H * W
    x_flat = x.reshape(N, C, S)

    kind = _device_kind()
    if target_block_bytes is None:
        target_block_bytes = _default_block_bytes(kind)

    itemsize = jnp.dtype(x.dtype).itemsize
    # Sublane packing multiple for this dtype: f32 -> 8, bf16 -> 16, int8/fp8 -> 32.
    sublane = {4: 8, 2: 16, 1: 32}.get(itemsize, 8)
    c_pad = _round_up(C, sublane)

    # Hoist per-channel affine derivation (tiny C-sized math, always f32).
    scale = weight.astype(jnp.float32) * jax.lax.rsqrt(
        running_var.astype(jnp.float32) + eps
    )
    shift = bias.astype(jnp.float32) - running_mean.astype(jnp.float32) * scale
    # bf16-native affine on bf16-VALU chips; f32 path for v5e and f32 inputs.
    native_bf16 = (x.dtype == jnp.bfloat16) and ("v6" in kind or "v7" in kind)
    compute_dtype = x.dtype if native_bf16 else jnp.float32
    scale2 = scale.astype(compute_dtype).reshape(C, 1)   # C on the sublane axis
    shift2 = shift.astype(compute_dtype).reshape(C, 1)

    # Spatial tile: largest 128-multiple sized against the sublane-PADDED C.
    ts = target_block_bytes // max(c_pad * itemsize, 1)
    ts = max(128, (ts // 128) * 128)
    if ts >= S:
        ts = S  # full spatial extent (no 128-alignment required for a full dim)
    n_s = pl.cdiv(S, ts)

    # Deep/small-S layers: widen the block over N (divisor of N -> exact blocks).
    bn = 1
    if n_s == 1:
        per_image = c_pad * _round_up(S, 128) * itemsize
        for cand in range(N, 0, -1):
            if N % cand == 0 and cand * per_image <= target_block_bytes:
                bn = cand
                break
    n_n = N // bn

    # v7x megacore: prefer an even total step count so neither TC trails a tile.
    if "v7" in kind and n_s > 1 and (n_n * n_s) % 2 == 1:
        for dec in range(1, 5):
            ts_try = ts - 128 * dec
            if ts_try < 128:
                break
            if (n_n * pl.cdiv(S, ts_try)) % 2 == 0:
                ts = ts_try
                n_s = pl.cdiv(S, ts)
                break

    # Explicit scoped-VMEM budget: 2 in + 2 out buffers of one padded block,
    # plus resident (double-buffered) params and slack.
    block_bytes = bn * c_pad * _round_up(ts, 128) * itemsize
    param_bytes = 2 * 2 * c_pad * 128 * jnp.dtype(compute_dtype).itemsize
    vmem_limit = int(
        min(max(4 * block_bytes + param_bytes + (2 << 20), 16 << 20), 48 << 20)
    )

    param_spec = pl.BlockSpec((C, 1), lambda n, s: (0, 0))
    xo_spec = pl.BlockSpec((bn, C, ts), lambda n, s: (n, 0, s))

    cost = pl.CostEstimate(
        flops=2 * N * C * S,
        transcendentals=0,
        bytes_accessed=2 * N * C * S * itemsize + 2 * C * 4,
    )

    out_flat = pl.pallas_call(
        _frozen_bn_kernel,
        out_shape=jax.ShapeDtypeStruct((N, C, S), x.dtype),
        grid_spec=pltpu.PrefetchScalarGridSpec(
            num_scalar_prefetch=0,
            grid=(n_n, n_s),
            in_specs=[xo_spec, param_spec, param_spec],
            out_specs=xo_spec,
        ),
        compiler_params=pltpu.CompilerParams(
            dimension_semantics=("parallel", "parallel"),
            vmem_limit_bytes=vmem_limit,
        ),
        cost_estimate=cost,
    )(x_flat, scale2, shift2)

    return out_flat.reshape(N, C, H, W)


if __name__ == "__main__":
    key = jax.random.PRNGKey(0)

    def make_params(k, C):
        kw, kb, km, kv = jax.random.split(k, 4)
        w = jnp.ones((C,), jnp.float32) + 0.1 * jax.random.normal(kw, (C,))
        b = 0.1 * jax.random.normal(kb, (C,), dtype=jnp.float32)
        rm = 0.5 * jax.random.normal(km, (C,), dtype=jnp.float32)
        rv = jnp.ones((C,), jnp.float32) + 0.1 * jnp.abs(jax.random.normal(kv, (C,)))
        return w, b, rm, rv

    def reference(x, w, b, rm, rv, eps=1e-5):
        C = x.shape[1]
        sc = w.astype(jnp.float32).reshape(1, C, 1, 1) * jax.lax.rsqrt(
            rv.astype(jnp.float32).reshape(1, C, 1, 1) + eps
        )
        sh = b.astype(jnp.float32).reshape(1, C, 1, 1) - rm.astype(
            jnp.float32
        ).reshape(1, C, 1, 1) * sc
        return (x.astype(jnp.float32) * sc + sh).astype(x.dtype)

    k1, k2, k3, k4, k5, k6 = jax.random.split(key, 6)

    # --- Test 1: spec shape (2, 4, 16, 16), single spatial tile ---
    x1 = jax.random.normal(k1, (2, 4, 16, 16), dtype=jnp.float32)
    p1 = make_params(k2, 4)
    o1 = jax.block_until_ready(frozen_batch_norm_2d(x1, *p1))
    assert o1.shape == x1.shape
    assert jnp.allclose(o1, reference(x1, *p1), atol=1e-5, rtol=1e-5)

    # --- Test 2: multi-tile + remainder spatial tile (S=400, ts=128, n_s=4) ---
    x2 = jax.random.normal(k3, (2, 8, 20, 20), dtype=jnp.float32)
    p2 = make_params(k4, 8)
    o2 = jax.block_until_ready(
        frozen_batch_norm_2d(x2, *p2, target_block_bytes=8 * 128 * 4)
    )
    assert jnp.allclose(o2, reference(x2, *p2), atol=1e-5, rtol=1e-5)

    # --- Test 3: deep-stage shape (S=49 < 128) in bf16: batch-amortized block ---
    x3 = jax.random.normal(k5, (4, 16, 7, 7), dtype=jnp.float32).astype(jnp.bfloat16)
    p3 = make_params(k6, 16)
    o3 = jax.block_until_ready(frozen_batch_norm_2d(x3, *p3))
    r3 = reference(x3, *p3)
    assert o3.dtype == jnp.bfloat16
    assert jnp.allclose(
        o3.astype(jnp.float32), r3.astype(jnp.float32), atol=5e-2, rtol=5e-2
    )

    print("KERNEL_OK")
</pallas_src>

<mosaic_0001>
module attributes {stable_mosaic.version = 11 : i64} {
  func.func @_frozen_bn_kernel(%arg0: i32, %arg1: i32, %arg2: memref<2x4x256xf32, #tpu.memory_space<vmem>>, %arg3: memref<4x1xf32, #tpu.memory_space<vmem>>, %arg4: memref<4x1xf32, #tpu.memory_space<vmem>>, %arg5: memref<2x4x256xf32, #tpu.memory_space<vmem>>) attributes {dimension_semantics = [#tpu.dimension_semantics<parallel>, #tpu.dimension_semantics<parallel>], iteration_bounds = array<i64: 1, 1>, scalar_prefetch = 0 : i64, scratch_operands = 0 : i64, tpu.core_type = #tpu.core_type<tc>, window_params = [{transform_indices = @transform_0, window_bounds = array<i64: 2, 4, 256>}, {pipeline_mode = #tpu.pipeline_mode<synchronous>, transform_indices = @transform_1, window_bounds = array<i64: 4, 1>}, {pipeline_mode = #tpu.pipeline_mode<synchronous>, transform_indices = @transform_2, window_bounds = array<i64: 4, 1>}, {transform_indices = @transform_3, window_bounds = array<i64: 2, 4, 256>}]} {
    %c0 = arith.constant 0 : index
    %c0_0 = arith.constant 0 : index
    %0 = vector.load %arg3[%c0, %c0_0] : memref<4x1xf32, #tpu.memory_space<vmem>>, vector<4x1xf32>
    %1 = vector.shape_cast %0 : vector<4x1xf32> to vector<1x4x1xf32>
    %c0_1 = arith.constant 0 : index
    %c0_2 = arith.constant 0 : index
    %2 = vector.load %arg4[%c0_1, %c0_2] : memref<4x1xf32, #tpu.memory_space<vmem>>, vector<4x1xf32>
    %3 = vector.shape_cast %2 : vector<4x1xf32> to vector<1x4x1xf32>
    %c0_3 = arith.constant 0 : index
    %c0_4 = arith.constant 0 : index
    %c0_5 = arith.constant 0 : index
    %4 = vector.load %arg2[%c0_3, %c0_4, %c0_5] : memref<2x4x256xf32, #tpu.memory_space<vmem>>, vector<2x4x256xf32>
    %5 = vector.broadcast %1 : vector<1x4x1xf32> to vector<2x4x256xf32>
    %6 = arith.mulf %4, %5 : vector<2x4x256xf32>
    %7 = vector.broadcast %3 : vector<1x4x1xf32> to vector<2x4x256xf32>
    %8 = arith.addf %6, %7 : vector<2x4x256xf32>
    %c0_6 = arith.constant 0 : index
    %c0_7 = arith.constant 0 : index
    %c0_8 = arith.constant 0 : index
    %9 = vector.load %arg5[%c0_6, %c0_7, %c0_8] : memref<2x4x256xf32, #tpu.memory_space<vmem>>, vector<2x4x256xf32>
    tpu.vector_store %arg5[%c0_6, %c0_7, %c0_8], %8 {strides = array<i32>} : memref<2x4x256xf32, #tpu.memory_space<vmem>>, vector<2x4x256xf32>,
    return
  }
  func.func @transform_0(%arg0: i32, %arg1: i32) -> (i32, i32, i32) {
    %c0_i32 = arith.constant 0 : i32
    %c0_i32_0 = arith.constant 0 : i32
    return %arg0, %c0_i32, %arg1 : i32, i32, i32
  }
  func.func @transform_1(%arg0: i32, %arg1: i32) -> (i32, i32) {
    %c0_i32 = arith.constant 0 : i32
    %c0_i32_0 = arith.constant 0 : i32
    %c0_i32_1 = arith.constant 0 : i32
    return %c0_i32, %c0_i32_0 : i32, i32
  }
  func.func @transform_2(%arg0: i32, %arg1: i32) -> (i32, i32) {
    %c0_i32 = arith.constant 0 : i32
    %c0_i32_0 = arith.constant 0 : i32
    %c0_i32_1 = arith.constant 0 : i32
    return %c0_i32, %c0_i32_0 : i32, i32
  }
  func.func @transform_3(%arg0: i32, %arg1: i32) -> (i32, i32, i32) {
    %c0_i32 = arith.constant 0 : i32
    %c0_i32_0 = arith.constant 0 : i32
    return %arg0, %c0_i32, %arg1 : i32, i32, i32
  }
}

</mosaic_0001>

<bundles_post_ra>
// kernel: tpu_custom_call.1
= control target key start
LH: loop header
LB: loop body
LE: loop exit
PB: predicated region body
PF: predicated region fallthrough
CT: control target
= control target key end

     0   :  { %8 = vsyncpa [#allocation3], 0  ;;  %s197_s0 = inlined_call_operand.hbm [shape: f32[2,4,256], index: 0, kind: input, shape index: {}]   ;;  %s198_s1 = inlined_call_operand.vmem [shape: f32[4,1], index: 1, kind: input, shape index: {}]   ;;  %s199_s2 = inlined_call_operand.vmem [shape: f32[4,1], index: 2, kind: input, shape index: {}]   ;;  %s200_s3 = inlined_call_operand.hbm [shape: f32[2,4,256], index: 3, kind: output, shape index: {}]  }
   0x1   :  { %9 = vsyncpa [#allocation4], 0  ;;  %s135_s12 = smov [#allocation2]   ;;  %s87_s16 = scalar_lea.hbm %s197_s0, 256 }
   0x2   :  { %s15_s13 = sshll.u32 %s135_s12, 4  ;;  %p88_p0 = scmp.ne.s32.totalorder %s197_s0, %s87_s16  ;;  %s16_s13 = int_to_ptr.vmem [resolvable:$true] %s15_s13 }
   0x3   :  { %p91_p1 = scmp.lt.u32.totalorder %s87_s16, %s197_s0 }
   0x5   :  { %p93_p2 = pnand %p91_p1, %p88_p0 }
   0x7   :  { %96 = shalt.err (!%p93_p2)
}
   0x8   :  { %s97_s21 = scalar_lea.vmem %s16_s13, 256  ;;  %p102_p4 = scmp.lt.s32.totalorder %s16_s13, %s16_s13 }
   0x9   :  { %p98_p3 = scmp.ne.s32.totalorder %s16_s13, %s97_s21  ;;  %p103_p5 = scmp.lt.s32.totalorder %s97_s21, %s97_s21 }
   0xb   :  { %p104_p6 = por %p103_p5, %p102_p4 }
   0xd   :  { %p105_p7 = pnand %p104_p6, %p98_p3 }
   0xf   :  { %108 = shalt.err (!%p105_p7)
}
  0x10   :  { %s136_s22 = smov 128   ;;  %s137_s23 = smov 8  }
  0x11   :  { %21 = dma.hbm_to_vmem [thread:$0]  %s197_s0, 256, %s16_s13, [#allocation3], %s136_s22, %s136_s22, %s137_s23  }
  0x12   :  { %131 = dma.done.wait [#allocation3], 256  }
  0x13   :  { %132 = vsyncadd [#allocation3], 4294967040  ;;  %v138_v0 = vmov 0   ;;  %v29_v1 = vld [vmem:[%s198_s1] sm:$0xf]  ;;  %v40_v5 = vlaneseq  ;;  %v32_v12 = vld [vmem:[#allocation2 + $0x8] sm:$0xff] }
  0x14   :  { %86 = vset.pattern.permute.xlu0 %v138_v0  ;;  %v30_v2 = vld [vmem:[%s199_s2] sm:$0xf]  ;;  %v139_v3 = vmov 839922192   ;;  %s140_s0 = smov [#allocation5]  }
  0x15   :  { %35 = vperm.xlu0 %86, %v29_v1   ;;  %v38_v4 = vunpack.c.l.s4 %v139_v3  ;;  %v41_v7 = vshrl.u32 %v40_v5, 7  ;;  %v31_v11 = vld [vmem:[#allocation2] sm:$0xff]  ;;  %s68_s30 = sshll.u32 %s140_s0, 4  ;;  %s69_s30 = int_to_ptr.vmem [resolvable:$true] %s68_s30 }
  0x16   :  { %s109_s1 = scalar_lea.vmem %s69_s30, 256  ;;  %p114_p9 = scmp.lt.s32.totalorder %s69_s30, %s69_s30 }
  0x17   :  { %v39_v6 = vunpack.c.0.s8 %v38_v4  ;;  %p110_p8 = scmp.ne.s32.totalorder %s69_s30, %s109_s1  ;;  %p115_p10 = scmp.lt.s32.totalorder %s109_s1, %s109_s1 }
  0x19   :  { %49 = vperm.xlu0 %86, %v30_v2   ;;  %v42_v8 = vsub.s32 %v39_v6, %v41_v7  ;;  %p116_p11 = por %p115_p10, %p114_p9 }
  0x1b   :  { %p117_p12 = pnand %p116_p11, %p110_p8 }
  0x94   :  { %v36_v9 = vpop.permute.xlu0 %35 }
  0x95   :  { %v43_v10 = vrot.slane %v36_v9, %v42_v8 }
  0x97   :  { %v45_v14 = vmul.f32 %v43_v10, %v31_v11  ;;  %v46_v15 = vmul.f32 %v43_v10, %v32_v12 }
  0x98   :  { %v50_v13 = vpop.permute.xlu0 %49 }
  0x99   :  { %v57_v16 = vrot.slane %v50_v13, %v42_v8 }
  0x9b   :  { %v59_v17 = vadd.f32 %v57_v16, %v45_v14  ;;  %v60_v18 = vadd.f32 %v57_v16, %v46_v15 }
  0x9d   :  { %61 = vst [vmem:[#allocation5] sm:$0xff] %v59_v17  ;;  %62 = vst [vmem:[#allocation5 + $0x8] sm:$0xff] %v60_v18 }
  0x9e   :  { %120 = shalt.err (!%p117_p12)
}
  0x9f   :  { %s121_s5 = scalar_lea.hbm %s200_s3, 256 }
  0xa0   :  { %p122_p13 = scmp.ne.s32.totalorder %s200_s3, %s121_s5  ;;  %p125_p0 = scmp.lt.u32.totalorder %s121_s5, %s200_s3 }
  0xa2   :  { %p127_p1 = pnand %p125_p0, %p122_p13 }
  0xa4   :  { %130 = shalt.err (!%p127_p1)
}
  0xa5   :  { %74 = dma.vmem_to_hbm [thread:$0]  %s69_s30, 256, %s200_s3, [#allocation4], %s136_s22, %s136_s22, %s137_s23  }
  0xa6   :  { %133 = dma.done.wait [#allocation4], 256  }
  0xa7   :  { %134 = vsyncadd [#allocation4], 4294967040 }
  0xa8   :  { %78 = vsyncpa [#allocation3], 1 }
  0xa9   :  { %79 = vsyncpa [#allocation4], 1 }

</bundles_post_ra>
